<compile_context>
chip_gen: v5e
topology: v5e:2x2
jax: 0.10.0
libtpu: 0.0.40
codegen_flags: <defaults>
</compile_context>

<pallas_src>
import jax
import jax.numpy as jnp
from jax import lax
from jax.experimental import pallas as pl
from jax.experimental.pallas import tpu as pltpu


def _round_up(x, m):
    return ((x + m - 1) // m) * m


def _gelu_exact(x):
    # matches torch nn.GELU() / HF ACT2FN['gelu'] (erf form); computed in f32
    return 0.5 * x * (1.0 + lax.erf(x * jnp.float32(0.7071067811865476)))


def projector_kernel(x_ref, w1_ref, b1_ref, w2_ref, b2_ref, o_ref, h_ref):
    # Grid: (i over row tiles [parallel], j over W2 output-column slabs [arbitrary]).
    # x_ref:  (tm, K)   row tile of flattened image features
    # w1_ref: (K,  H)   full linear_1 weight, (in, out) layout, single-buffered
    # b1_ref: (1,  H)
    # w2_ref: (H,  tn)  column slab of linear_2 weight, streamed over j
    # b2_ref: (1,  tn)
    # o_ref:  (tm, tn)
    # h_ref:  (tm, H)   VMEM scratch: gelu(x @ W1 + b1) for the current row tile
    j = pl.program_id(1)

    @pl.when(j == 0)
    def _():
        # First matmul + bias + GELU, computed once per row tile (native-dtype
        # operands on the MXU, f32 accumulation).
        acc = jnp.dot(x_ref[...], w1_ref[...], preferred_element_type=jnp.float32)
        acc = acc + b1_ref[...].astype(jnp.float32)
        h_ref[...] = _gelu_exact(acc).astype(h_ref.dtype)

    # Second matmul against the current column slab of W2.
    y = jnp.dot(h_ref[...], w2_ref[...], preferred_element_type=jnp.float32)
    y = y + b2_ref[...].astype(jnp.float32)
    o_ref[...] = y.astype(o_ref.dtype)


def prepare_projector_weights(w1, b1, w2, b2):
    """One-time (load-time) conversion from torch nn.Linear layout.

    w1: (H, K), b1: (H,), w2: (H, H), b2: (H,)  ->  (K,H), (1,H), (H,H), (1,H)."""
    return (jnp.transpose(w1), b1.reshape(1, -1),
            jnp.transpose(w2), b2.reshape(1, -1))


def llava_projector(image_features, w1_t, b1, w2_t, b2, *, tm=256, tn=512):
    """image_features: (B, S, K); w1_t: (K, H); b1: (1, H); w2_t: (H, H); b2: (1, H).

    image_features / w1_t / w2_t should share a dtype (f32 or bf16); the MXU
    accumulates in f32 either way. Returns (B, S, H) in image_features.dtype."""
    B, S, K = image_features.shape
    Kw, H = w1_t.shape
    assert Kw == K, "w1_t must be (K, H)"
    assert w2_t.shape == (H, H), "w2_t must be (H, H)"
    b1 = b1.reshape(1, H)
    b2 = b2.reshape(1, H)

    M = B * S
    x2d = image_features.reshape(M, K)
    out_dtype = image_features.dtype

    # Row tile: multiple of 8 sublanes, no larger than the (padded) row count.
    tm = max(8, _round_up(tm, 8))
    tm = min(tm, _round_up(M, 8))
    M_pad = _round_up(M, tm)
    if M_pad != M:
        x2d = jnp.pad(x2d, ((0, M_pad - M), (0, 0)))

    # Output-column slab for W2: a multiple of 128 lanes that divides H, else full H.
    if tn % 128 != 0 or H % tn != 0 or tn > H:
        tn = H

    # Intermediate h kept in the second-matmul operand dtype (bf16 weights -> bf16 h).
    h_dtype = w2_t.dtype

    nm = M_pad // tm
    nn = H // tn

    # Explicit VMEM budget (double-buffered streams, single-buffered resident weights).
    def nbytes(n_elems, dtype):
        return int(n_elems) * jnp.dtype(dtype).itemsize

    vmem_bytes = (
        2 * nbytes(tm * K, x2d.dtype)        # x tile (double-buffered)
        + 1 * nbytes(K * H, w1_t.dtype)      # W1 (resident, single-buffered)
        + 1 * nbytes(H, b1.dtype)            # b1 (resident, single-buffered)
        + 2 * nbytes(H * tn, w2_t.dtype)     # W2 slab (double-buffered)
        + 2 * nbytes(tn, b2.dtype)           # b2 slab
        + 2 * nbytes(tm * tn, out_dtype)     # out tile (double-buffered)
        + 1 * nbytes(tm * H, h_dtype)        # h scratch
    )
    vmem_limit = min(max(int(1.3 * vmem_bytes) + (2 << 20), 16 << 20), 100 << 20)

    out2d = pl.pallas_call(
        projector_kernel,
        out_shape=jax.ShapeDtypeStruct((M_pad, H), out_dtype),
        grid_spec=pltpu.PrefetchScalarGridSpec(
            num_scalar_prefetch=0,
            grid=(nm, nn),
            in_specs=[
                pl.BlockSpec((tm, K), lambda i, j: (i, 0)),      # x row tile
                pl.BlockSpec((K, H), lambda i, j: (0, 0),        # W1 (constant)
                             pipeline_mode=pl.Buffered(1)),
                pl.BlockSpec((1, H), lambda i, j: (0, 0),        # b1 (constant)
                             pipeline_mode=pl.Buffered(1)),
                pl.BlockSpec((H, tn), lambda i, j: (0, j)),      # W2 column slab
                pl.BlockSpec((1, tn), lambda i, j: (0, j)),      # b2 slab
            ],
            out_specs=pl.BlockSpec((tm, tn), lambda i, j: (i, j)),
            scratch_shapes=[pltpu.VMEM((tm, H), h_dtype)],
        ),
        compiler_params=pltpu.CompilerParams(
            dimension_semantics=("parallel", "arbitrary"),
            vmem_limit_bytes=vmem_limit,
        ),
    )(x2d, w1_t, b1, w2_t, b2)

    if M_pad != M:
        out2d = out2d[:M]
    return out2d.reshape(B, S, H)


def _reference(image_features, w1_t, b1, w2_t, b2):
    x = image_features.astype(jnp.float32)
    h = x @ w1_t.astype(jnp.float32) + b1.astype(jnp.float32)
    h = _gelu_exact(h)
    y = h @ w2_t.astype(jnp.float32) + b2.astype(jnp.float32)
    return y.astype(image_features.dtype)


if __name__ == "__main__":
    key = jax.random.PRNGKey(0)
    k = jax.random.split(key, 10)

    # ---- test 1: tiny f32 shapes (single row tile, full-H slab) ----
    B, S, K, H = 2, 8, 32, 32
    x = jax.random.normal(k[0], (B, S, K), dtype=jnp.float32)
    w1 = jax.random.normal(k[1], (H, K), dtype=jnp.float32) * 0.05   # torch (out, in)
    b1 = jax.random.normal(k[2], (H,), dtype=jnp.float32) * 0.01
    w2 = jax.random.normal(k[3], (H, H), dtype=jnp.float32) * 0.05
    b2 = jax.random.normal(k[4], (H,), dtype=jnp.float32) * 0.01

    params = prepare_projector_weights(w1, b1, w2, b2)
    out = jax.block_until_ready(llava_projector(x, *params))
    ref = _reference(x, *params)
    assert out.shape == (B, S, H)
    assert jnp.allclose(out, ref, atol=1e-5, rtol=1e-5), "f32 mismatch vs reference"

    # ---- test 2: bf16, exercises row padding + W2 column tiling ----
    B2, S2, K2, H2 = 2, 100, 128, 256          # M=200 -> padded to 256 with tm=64
    x2 = jax.random.normal(k[5], (B2, S2, K2), dtype=jnp.bfloat16)
    w1b = (jax.random.normal(k[6], (H2, K2), dtype=jnp.float32) * 0.05).astype(jnp.bfloat16)
    b1b = (jax.random.normal(k[7], (H2,), dtype=jnp.float32) * 0.01).astype(jnp.bfloat16)
    w2b = (jax.random.normal(k[8], (H2, H2), dtype=jnp.float32) * 0.05).astype(jnp.bfloat16)
    b2b = (jax.random.normal(k[9], (H2,), dtype=jnp.float32) * 0.01).astype(jnp.bfloat16)

    params2 = prepare_projector_weights(w1b, b1b, w2b, b2b)
    out2 = jax.block_until_ready(llava_projector(x2, *params2, tm=64, tn=128))
    ref2 = _reference(x2, *params2)
    assert out2.shape == (B2, S2, H2)
    err = jnp.max(jnp.abs(out2.astype(jnp.float32) - ref2.astype(jnp.float32)))
    assert err < 3e-2, f"bf16 mismatch vs reference (max abs err {err})"

    print("KERNEL_OK")
</pallas_src>

<mosaic_0001>
module attributes {stable_mosaic.version = 11 : i64} {
  func.func @projector_kernel(%arg0: i32, %arg1: i32, %arg2: memref<16x32xf32, #tpu.memory_space<vmem>>, %arg3: memref<32x32xf32, #tpu.memory_space<vmem>>, %arg4: memref<1x32xf32, #tpu.memory_space<vmem>>, %arg5: memref<32x32xf32, #tpu.memory_space<vmem>>, %arg6: memref<1x32xf32, #tpu.memory_space<vmem>>, %arg7: memref<16x32xf32, #tpu.memory_space<vmem>>, %arg8: memref<16x32xf32, #tpu.memory_space<vmem>>) attributes {dimension_semantics = [#tpu.dimension_semantics<parallel>, #tpu.dimension_semantics<arbitrary>], iteration_bounds = array<i64: 1, 1>, scalar_prefetch = 0 : i64, scratch_operands = 1 : i64, tpu.core_type = #tpu.core_type<tc>, window_params = [{transform_indices = @transform_0, window_bounds = array<i64: 16, 32>}, {pipeline_mode = #tpu.pipeline_mode<synchronous>, transform_indices = @transform_1, window_bounds = array<i64: 32, 32>}, {pipeline_mode = #tpu.pipeline_mode<synchronous>, transform_indices = @transform_2, window_bounds = array<i64: 1, 32>}, {transform_indices = @transform_3, window_bounds = array<i64: 32, 32>}, {transform_indices = @transform_4, window_bounds = array<i64: 1, 32>}, {transform_indices = @transform_5, window_bounds = array<i64: 16, 32>}]} {
    %c0_i32 = arith.constant 0 : i32
    %0 = arith.cmpi eq, %arg1, %c0_i32 : i32
    %1 = arith.extui %0 : i1 to i32
    %c0_i32_0 = arith.constant 0 : i32
    %2 = arith.cmpi ne, %1, %c0_i32_0 : i32
    scf.if %2 {
      %c0_8 = arith.constant 0 : index
      %c0_9 = arith.constant 0 : index
      %10 = vector.load %arg2[%c0_8, %c0_9] : memref<16x32xf32, #tpu.memory_space<vmem>>, vector<16x32xf32>
      %c0_10 = arith.constant 0 : index
      %c0_11 = arith.constant 0 : index
      %11 = vector.load %arg3[%c0_10, %c0_11] : memref<32x32xf32, #tpu.memory_space<vmem>>, vector<32x32xf32>
      %cst_12 = arith.constant dense<0.000000e+00> : vector<16x32xf32>
      %12 = tpu.matmul %10, %11, %cst_12 {dimension_numbers = #tpu.dot_dimension_numbers<[1], [0], [0], [1], [0, 0, 1, 1], [], []>} : vector<16x32xf32>, vector<32x32xf32>, vector<16x32xf32> -> vector<16x32xf32>
      %c0_13 = arith.constant 0 : index
      %c0_14 = arith.constant 0 : index
      %13 = vector.load %arg4[%c0_13, %c0_14] : memref<1x32xf32, #tpu.memory_space<vmem>>, vector<1x32xf32>
      %14 = vector.broadcast %13 : vector<1x32xf32> to vector<16x32xf32>
      %15 = arith.addf %12, %14 : vector<16x32xf32>
      %cst_15 = arith.constant 5.000000e-01 : f32
      %16 = vector.broadcast %cst_15 : f32 to vector<16x32xf32>
      %17 = arith.mulf %16, %15 : vector<16x32xf32>
      %cst_16 = arith.constant 0.707106769 : f32
      %18 = vector.broadcast %cst_16 : f32 to vector<16x32xf32>
      %19 = arith.mulf %15, %18 : vector<16x32xf32>
      %20 = math.erf %19 : vector<16x32xf32>
      %cst_17 = arith.constant 1.000000e+00 : f32
      %21 = vector.broadcast %cst_17 : f32 to vector<16x32xf32>
      %22 = arith.addf %21, %20 : vector<16x32xf32>
      %23 = arith.mulf %17, %22 : vector<16x32xf32>
      %c0_18 = arith.constant 0 : index
      %c0_19 = arith.constant 0 : index
      %24 = vector.load %arg8[%c0_18, %c0_19] : memref<16x32xf32, #tpu.memory_space<vmem>>, vector<16x32xf32>
      tpu.vector_store %arg8[%c0_18, %c0_19], %23 {strides = array<i32>} : memref<16x32xf32, #tpu.memory_space<vmem>>, vector<16x32xf32>,
    } else {
    }
    %c0 = arith.constant 0 : index
    %c0_1 = arith.constant 0 : index
    %3 = vector.load %arg8[%c0, %c0_1] : memref<16x32xf32, #tpu.memory_space<vmem>>, vector<16x32xf32>
    %c0_2 = arith.constant 0 : index
    %c0_3 = arith.constant 0 : index
    %4 = vector.load %arg5[%c0_2, %c0_3] : memref<32x32xf32, #tpu.memory_space<vmem>>, vector<32x32xf32>
    %cst = arith.constant dense<0.000000e+00> : vector<16x32xf32>
    %5 = tpu.matmul %3, %4, %cst {dimension_numbers = #tpu.dot_dimension_numbers<[1], [0], [0], [1], [0, 0, 1, 1], [], []>} : vector<16x32xf32>, vector<32x32xf32>, vector<16x32xf32> -> vector<16x32xf32>
    %c0_4 = arith.constant 0 : index
    %c0_5 = arith.constant 0 : index
    %6 = vector.load %arg6[%c0_4, %c0_5] : memref<1x32xf32, #tpu.memory_space<vmem>>, vector<1x32xf32>
    %7 = vector.broadcast %6 : vector<1x32xf32> to vector<16x32xf32>
    %8 = arith.addf %5, %7 : vector<16x32xf32>
    %c0_6 = arith.constant 0 : index
    %c0_7 = arith.constant 0 : index
    %9 = vector.load %arg7[%c0_6, %c0_7] : memref<16x32xf32, #tpu.memory_space<vmem>>, vector<16x32xf32>
    tpu.vector_store %arg7[%c0_6, %c0_7], %8 {strides = array<i32>} : memref<16x32xf32, #tpu.memory_space<vmem>>, vector<16x32xf32>,
    return
  }
  func.func @transform_0(%arg0: i32, %arg1: i32) -> (i32, i32) {
    %c0_i32 = arith.constant 0 : i32
    %c0_i32_0 = arith.constant 0 : i32
    return %arg0, %c0_i32 : i32, i32
  }
  func.func @transform_1(%arg0: i32, %arg1: i32) -> (i32, i32) {
    %c0_i32 = arith.constant 0 : i32
    %c0_i32_0 = arith.constant 0 : i32
    %c0_i32_1 = arith.constant 0 : i32
    return %c0_i32, %c0_i32_0 : i32, i32
  }
  func.func @transform_2(%arg0: i32, %arg1: i32) -> (i32, i32) {
    %c0_i32 = arith.constant 0 : i32
    %c0_i32_0 = arith.constant 0 : i32
    %c0_i32_1 = arith.constant 0 : i32
    return %c0_i32, %c0_i32_0 : i32, i32
  }
  func.func @transform_3(%arg0: i32, %arg1: i32) -> (i32, i32) {
    %c0_i32 = arith.constant 0 : i32
    %c0_i32_0 = arith.constant 0 : i32
    return %c0_i32, %arg1 : i32, i32
  }
  func.func @transform_4(%arg0: i32, %arg1: i32) -> (i32, i32) {
    %c0_i32 = arith.constant 0 : i32
    %c0_i32_0 = arith.constant 0 : i32
    return %c0_i32, %arg1 : i32, i32
  }
  func.func @transform_5(%arg0: i32, %arg1: i32) -> (i32, i32) {
    %c0_i32 = arith.constant 0 : i32
    return %arg0, %arg1 : i32, i32
  }
}

</mosaic_0001>

<bundles_post_ra>
// kernel: tpu_custom_call.1
= control target key start
LH: loop header
LB: loop body
LE: loop exit
PB: predicated region body
PF: predicated region fallthrough
CT: control target
= control target key end

     0   :  { %10 = vsyncpa [#allocation4], 0  ;;  %s484_s0 = inlined_call_operand.hbm [shape: f32[16,32], index: 0, kind: input, shape index: {}]   ;;  %s485_s1 = inlined_call_operand.hbm [shape: f32[32,32], index: 1, kind: input, shape index: {}]   ;;  %s486_s2 = inlined_call_operand.vmem [shape: f32[1,32], index: 2, kind: input, shape index: {}]   ;;  %s487_s3 = inlined_call_operand.hbm [shape: f32[32,32], index: 3, kind: input, shape index: {}]   ;;  %s488_s4 = inlined_call_operand.vmem [shape: f32[1,32], index: 4, kind: input, shape index: {}]   ;;  %s489_s5 = inlined_call_operand.hbm [shape: f32[16,32], index: 5, kind: output, shape index: {}]  }
   0x1   :  { %11 = vsyncpa [#allocation7], 0 }
   0x2   :  { %12 = vsyncpa [#allocation5], 0  ;;  %s30_s20 = sshll.u32 %s485_s1, 4  ;;  %s392_s21 = smov [#allocation6]   ;;  %s31_s20 = int_to_ptr.hbm [resolvable:$true] %s30_s20 }
   0x3   :  { %s32_s22 = sshll.u32 %s392_s21, 4  ;;  %s17_s25 = sshll.u32 %s484_s0, 4  ;;  %s33_s22 = int_to_ptr.vmem [resolvable:$true] %s32_s22  ;;  %s18_s25 = int_to_ptr.hbm [resolvable:$true] %s17_s25 }
   0x4   :  { %s393_s26 = smov 128   ;;  %s394_s27 = smov 8  }
   0x5   :  { %38 = dma.hbm_to_vmem [thread:$0]  %s31_s20, 512, %s33_s22, [#allocation7], %s393_s26, %s393_s26, %s394_s27  }
   0x6   :  { %s395_s28 = smov [#allocation3]   ;;  %s45_s1 = sshll.u32 %s487_s3, 4  ;;  %s46_s1 = int_to_ptr.hbm [resolvable:$true] %s45_s1 }
   0x7   :  { %s19_s29 = sshll.u32 %s395_s28, 4  ;;  %s396_s0 = smov [#allocation8]   ;;  %s20_s29 = int_to_ptr.vmem [resolvable:$true] %s19_s29 }
   0x8   :  { %25 = dma.hbm_to_vmem [thread:$0]  %s18_s25, 256, %s20_s29, [#allocation4], %s393_s26, %s393_s26, %s394_s27  }
   0x9   :  { %s47_s7 = sshll.u32 %s396_s0, 4  ;;  %s48_s7 = int_to_ptr.vmem [resolvable:$true] %s47_s7 }
   0xa   :  { %53 = dma.hbm_to_vmem [thread:$0]  %s46_s1, 512, %s48_s7, [#allocation7], %s393_s26, %s393_s26, %s394_s27  }
   0xb   :  { %386 = dma.done.wait [#allocation4], 256  }
   0xc   :  { %387 = vsyncadd [#allocation4], 4294967040 }
   0xd   :  { %388 = dma.done.wait [#allocation7], 1024  }
   0xe   :  { %389 = vsyncadd [#allocation7], 4294966272  ;;  %v77_v0 = vld [vmem:[#allocation6 + $0x18] sm:$0xff]  ;;  %v76_v1 = vld [vmem:[#allocation6 + $0x10] sm:$0xff]  ;;  %vm82_vm0 = vcmask 261120   ;;  %s397_s10 = smov [#allocation9]  }
   0xf   :  { %101 = vmatpush.msra.mxu0 %v77_v0  ;;  %270 = vmatpush.msra.mxu2 %v77_v0  ;;  %v75_v2 = vld [vmem:[#allocation6 + $0x8] sm:$0xff]  ;;  %v74_v3 = vld [vmem:[#allocation6] sm:$0xff]  ;;  %v72_v4 = vld [vmem:[#allocation3] sm:$0xff]  ;;  %s248_s11 = sshll.u32 %s397_s10, 4  ;;  %s250_s14 = sshll.u32 %s489_s5, 4  ;;  %s249_s11 = int_to_ptr.vmem [resolvable:$true] %s248_s11  ;;  %s251_s14 = int_to_ptr.hbm [resolvable:$true] %s250_s14 }
  0x10   :  { %v73_v5 = vld [vmem:[#allocation3 + $0x8] sm:$0xff]  ;;  %v284_v6 = vld [vmem:[%s486_s2] ss:$0 sm:$0xff]  ;;  %v206_v43 = vld [vmem:[#allocation8 + $0x10] sm:$0xff] }
  0x11   :  { %102 = vmatpush.msra.mxu0 %v76_v1  ;;  %271 = vmatpush.msra.mxu2 %v76_v1  ;;  %v207_v40 = vld [vmem:[#allocation8 + $0x18] sm:$0xff]  ;;  %v205_v48 = vld [vmem:[#allocation8 + $0x8] sm:$0xff]  ;;  %v204_v49 = vld [vmem:[#allocation8] sm:$0xff] }
  0x12   :  { %231 = vmatpush.msra.mxu1 %v207_v40  ;;  %274 = vmatpush.msra.mxu3 %v207_v40 }
  0x13   :  { %103 = vmatpush.msra.mxu0 %v75_v2  ;;  %272 = vmatpush.msra.mxu2 %v75_v2 }
  0x14   :  { %232 = vmatpush.msra.mxu1 %v206_v43  ;;  %275 = vmatpush.msra.mxu3 %v206_v43 }
  0x15   :  { %104 = vmatpush.msra.mxu0 %v74_v3  ;;  %273 = vmatpush.msra.mxu2 %v74_v3 }
  0x16   :  { %264 = vmatmul.msk.f32.vlgmr.msra.gmra.mxu0 %vm82_vm0, %v72_v4  ;;  %265 = vmatmul.msk.f32.vlgmr.msra.gmra.mxu2 %vm82_vm0, %v73_v5 }
  0x17   :  { %233 = vmatpush.msra.mxu1 %v205_v48  ;;  %276 = vmatpush.msra.mxu3 %v205_v48 }
  0x19   :  { %234 = vmatpush.msra.mxu1 %v204_v49  ;;  %277 = vmatpush.msra.mxu3 %v204_v49 }
  0x93   :  { %v106_v7 = vpop.f32.mrf.mxu0 }
  0x94   :  { %v451_v8 = vadd.f32 %v284_v6, %v106_v7 }
  0x96   :  { %v454_v9 = vmul.f32 0.70710677, %v451_v8 }
  0x98   :  { %v116_v10 = vmul.f32 %v454_v9, %v454_v9 }
  0x99   :  { %v109_v11 = vpop.f32.mrf.mxu2 }
  0x9a   :  { %v117_v12 = vmin.f32 %v116_v10, 16.0  ;;  %v458_v13 = vadd.f32 %v284_v6, %v109_v11 }
  0x9c   :  { %v118_v14 = vmul.f32 2.1237322e-06, %v117_v12  ;;  %v129_v15 = vmul.f32 3.8918573e-05, %v117_v12  ;;  %v461_v16 = vmul.f32 0.70710677, %v458_v13 }
  0x9e   :  { %v119_v17 = vadd.f32 0.00028619796, %v118_v14  ;;  %v130_v18 = vadd.f32 0.001143296, %v129_v15  ;;  %v156_v19 = vmul.f32 %v461_v16, %v461_v16 }
  0xa0   :  { %v120_v20 = vmul.f32 %v119_v17, %v117_v12  ;;  %v131_v21 = vmul.f32 %v130_v18, %v117_v12  ;;  %v157_v22 = vmin.f32 %v156_v19, 16.0 }
  0xa2   :  { %v132_v23 = vadd.f32 0.014752088, %v131_v21  ;;  %v121_v24 = vadd.f32 0.0036580483, %v120_v20  ;;  %v158_v25 = vmul.f32 2.1237322e-06, %v157_v22 }
  0xa3   :  { %v169_v26 = vmul.f32 3.8918573e-05, %v157_v22  ;;  %v112_v21 = vmul.f32 0.5, %v451_v8 }
  0xa4   :  { %v133_v27 = vmul.f32 %v132_v23, %v117_v12  ;;  %v159_v28 = vadd.f32 0.00028619796, %v158_v25  ;;  %v122_v31 = vmul.f32 %v121_v24, %v117_v12 }
  0xa5   :  { %v170_v29 = vadd.f32 0.001143296, %v169_v26 }
  0xa6   :  { %v134_v30 = vadd.f32 0.112945676, %v133_v27  ;;  %v160_v32 = vmul.f32 %v159_v28, %v157_v22  ;;  %v123_v38 = vadd.f32 0.05243302, %v122_v31 }
  0xa7   :  { %v171_v33 = vmul.f32 %v170_v29, %v157_v22  ;;  %v113_v29 = vmul.f32 0.5, %v458_v13 }
  0xa8   :  { %v135_v34 = vmul.f32 %v134_v30, %v117_v12  ;;  %v161_v37 = vadd.f32 0.0036580483, %v160_v32  ;;  %v124_v46 = vmul.f32 %v123_v38, %v117_v12 }
  0xa9   :  { %v172_v35 = vadd.f32 0.014752088, %v171_v33 }
  0xaa   :  { %v136_v36 = vadd.f32 0.4994258, %v135_v34  ;;  %v162_v45 = vmul.f32 %v161_v37, %v157_v22  ;;  %v125_v52 = vadd.f32 0.18741608, %v124_v46 }
  0xab   :  { %v173_v39 = vmul.f32 %v172_v35, %v157_v22 }
  0xac   :  { %v137_v41 = vmul.f32 %v136_v36, %v117_v12  ;;  %v163_v51 = vadd.f32 0.05243302, %v162_v45  ;;  %v126_v57 = vmul.f32 %v125_v52, %v117_v12 }
  0xad   :  { %v174_v42 = vadd.f32 0.112945676, %v173_v39 }
  0xae   :  { %v138_v44 = vadd.f32 1.0, %v137_v41  ;;  %v164_v56 = vmul.f32 %v163_v51, %v157_v22  ;;  %v127_v62 = vadd.f32 1.1283791, %v126_v57 }
  0xaf   :  { %v175_v47 = vmul.f32 %v174_v42, %v157_v22 }
  0xb0   :  { %286 = vrcp.f32 %v138_v44  ;;  %v150_v60 = vand.u32 2147483648, %v138_v44  ;;  %v165_v61 = vadd.f32 0.18741608, %v164_v56  ;;  %v148_v0 = vand.u32 2147483647, %v138_v44 }
  0xb1   :  { %v176_v50 = vadd.f32 0.4994258, %v175_v47  ;;  %vm144_vm2 = vweird.f32 %v138_v44  ;;  %v128_v6 = vmul.f32 %v127_v62, %v454_v9 }
  0xb2   :  { %v151_v3 = vor.u32 1.1754944e-38, %v150_v60  ;;  %v166_v4 = vmul.f32 %v165_v61, %v157_v22  ;;  %vm149_vm4 = vcmp.eq.f32.partialorder %v148_v0, 8.507059e+37 }
  0xb3   :  { %v177_v53 = vmul.f32 %v176_v50, %v157_v22 }
  0xb4   :  { %v167_v15 = vadd.f32 1.1283791, %v166_v4 }
  0xb5   :  { %v178_v54 = vadd.f32 1.0, %v177_v53 }
  0xb6   :  { %v287_v55 = vpop.eup %286  ;;  %v168_v9 = vmul.f32 %v167_v15, %v461_v16  ;;  %v285_v16 = vld [vmem:[%s488_s4] ss:$0 sm:$0xff] }
  0xb7   :  { %v140_v58 = vmul.f32 %v287_v55, %v138_v44  ;;  %288 = vrcp.f32 %v178_v54  ;;  %vm145_vm1 = vweird.f32 %v287_v55  ;;  %v190_v14 = vand.u32 2147483648, %v178_v54 }
  0xb8   :  { %vm146_vm3 = vmor %vm144_vm2, %vm145_vm1  ;;  %v188_v18 = vand.u32 2147483647, %v178_v54  ;;  %vm184_vm6 = vweird.f32 %v178_v54 }
  0xb9   :  { %v141_v59 = vsub.f32 1.0, %v140_v58  ;;  %v191_v22 = vor.u32 1.1754944e-38, %v190_v14 }
  0xba   :  { %vm189_vm8 = vcmp.eq.f32.partialorder %v188_v18, 8.507059e+37 }
  0xbb   :  { %v142_v63 = vmul.f32 %v287_v55, %v141_v59 }
  0xbd   :  { %v289_v1 = vpop.eup %288  ;;  %v143_v2 = vadd.f32 %v287_v55, %v142_v63 }
  0xbe   :  { %v180_v5 = vmul.f32 %v289_v1, %v178_v54  ;;  %vm185_vm5 = vweird.f32 %v289_v1 }
  0xbf   :  { %v147_v7 = vsel %vm146_vm3, %v287_v55, %v143_v2  ;;  %vm186_vm7 = vmor %vm184_vm6, %vm185_vm5 }
  0xc0   :  { %v152_v10 = vsel %vm149_vm4, %v151_v3, %v147_v7  ;;  %v181_v11 = vsub.f32 1.0, %v180_v5 }
  0xc1   :  { %v153_v12 = vmul.f32 %v152_v10, %v128_v6 }
  0xc2   :  { %v182_v17 = vmul.f32 %v289_v1, %v181_v11 }
  0xc3   :  { %v266_v19 = vclamps-f32 %v153_v12, 1.0 }
  0xc4   :  { %v183_v20 = vadd.f32 %v289_v1, %v182_v17 }
  0xc5   :  { %v196_v23 = vadd.f32 1.0, %v266_v19 }
  0xc6   :  { %v187_v24 = vsel %vm186_vm7, %v289_v1, %v183_v20 }
  0xc7   :  { %v198_v25 = vmul.f32 %v196_v23, %v112_v21  ;;  %v192_v26 = vsel %vm189_vm8, %v191_v22, %v187_v24 }
  0xc8   :  { %v193_v27 = vmul.f32 %v192_v26, %v168_v9 }
  0xc9   :  { %200 = vst.msk [vmem:[#allocation2] sm:$0xff] %vm82_vm0, %v198_v25 }
  0xca   :  { %v267_v28 = vclamps-f32 %v193_v27, 1.0 }
  0xcc   :  { %v197_v30 = vadd.f32 1.0, %v267_v28 }
  0xce   :  { %v199_v31 = vmul.f32 %v197_v30, %v113_v29 }
  0xd0   :  { %201 = vst.msk [vmem:[#allocation2 + $0x8] sm:$0xff] %vm82_vm0, %v199_v31  ;;  %v202_v8 = vld [vmem:[#allocation2] sm:$0xff] }
  0xd1   :  { %268 = vmatmul.msk.f32.vlgmr.msra.gmra.mxu1 %vm82_vm0, %v202_v8 }
  0xd7   :  { %v203_v32 = vld [vmem:[#allocation2 + $0x8] sm:$0xff] }
  0xd8   :  { %269 = vmatmul.msk.f32.vlgmr.msra.gmra.mxu3 %vm82_vm0, %v203_v32 }
 0x14e   :  { %v236_v33 = vpop.f32.mrf.mxu1 }
 0x14f   :  { %v237_v34 = vadd.f32 %v285_v16, %v236_v33 }
 0x151   :  { %242 = vst.msk [vmem:[#allocation9] sm:$0xff] %vm82_vm0, %v237_v34 }
 0x15b   :  { %v239_v13 = vpop.f32.mrf.mxu3 }
 0x15c   :  { %v240_v35 = vadd.f32 %v285_v16, %v239_v13 }
 0x15e   :  { %243 = vst.msk [vmem:[#allocation9 + $0x8] sm:$0xff] %vm82_vm0, %v240_v35 }
 0x15f   :  { %256 = dma.vmem_to_hbm [thread:$0]  %s249_s11, 256, %s251_s14, [#allocation5], %s393_s26, %s393_s26, %s394_s27  }
 0x160   :  { %390 = dma.done.wait [#allocation5], 256  }
 0x161   :  { %391 = vsyncadd [#allocation5], 4294967040 }
 0x162   :  { %261 = vsyncpa [#allocation4], 1 }
 0x163   :  { %262 = vsyncpa [#allocation7], 1 }
 0x164   :  { %263 = vsyncpa [#allocation5], 1 }

</bundles_post_ra>
